<compile_context>
chip_gen: v5e
topology: v5e:2x2
jax: 0.10.0
libtpu: 0.0.40
codegen_flags: <defaults>
</compile_context>

<pallas_src>
import functools

import jax
import jax.numpy as jnp
from jax.experimental import pallas as pl
from jax.experimental.pallas import tpu as pltpu


def _round_up(x, m):
    return (x + m - 1) // m * m


def _gaussian_smearing_kernel(coeff, start, step, r, dist_ref, out_ref):
    # dist_ref: (blk, 1)  block of distances
    # out_ref:  (blk, r)  output tile (r == full resolution)
    # Recompute the static offset row in-kernel: off[j] = start + j * step.
    j = jax.lax.broadcasted_iota(jnp.int32, (1, r), 1).astype(jnp.float32)
    off = start + step * j                      # (1, r)
    d = dist_ref[...]                           # (blk, 1)
    diff = d - off                              # (blk, r) via broadcasting
    out_ref[...] = jnp.exp(coeff * diff * diff).astype(out_ref.dtype)


def gaussian_smearing(dist, *, start=0.0, stop=5.0, resolution=50, width=0.05,
                      block_n=4096, out_dtype=jnp.float32):
    """dist: (N,) float -> (N, resolution) Gaussian basis expansion.

    block_n: rows per grid step.  2048-8192 recommended for large N (mem-bound
    regime); it is clamped down automatically for small inputs.
    out_dtype: jnp.float32 (default, matches torch) or jnp.bfloat16 if the
    downstream consumer (typically a Linear) tolerates it — halves HBM
    writeback; compute stays f32 either way.
    """
    n = dist.shape[0]
    r = int(resolution)
    coeff = -0.5 / ((stop - start) * width) ** 2
    step = (stop - start) / (resolution - 1) if resolution > 1 else 0.0

    # Effective block: multiple of 8 rows (sublane alignment), no larger than
    # the (row-aligned) problem size.
    blk = min(int(block_n), _round_up(n, 8))
    blk = _round_up(blk, 8)
    n_pad = _round_up(n, blk)

    dist_f32 = dist.astype(jnp.float32)
    if n_pad != n:
        dist_f32 = jnp.pad(dist_f32, (0, n_pad - n))
    dist2d = dist_f32.reshape(n_pad, 1)

    kernel = functools.partial(
        _gaussian_smearing_kernel, float(coeff), float(start), float(step), r)

    out = pl.pallas_call(
        kernel,
        out_shape=jax.ShapeDtypeStruct((n_pad, r), out_dtype),
        grid_spec=pltpu.PrefetchScalarGridSpec(
            num_scalar_prefetch=0,
            grid=(n_pad // blk,),
            in_specs=[pl.BlockSpec((blk, 1), lambda i: (i, 0))],
            out_specs=pl.BlockSpec((blk, r), lambda i: (i, 0)),
        ),
        compiler_params=pltpu.CompilerParams(
            dimension_semantics=("parallel",)),
    )(dist2d)

    if n_pad != n:
        out = out[:n]
    return out


def gaussian_smearing_ref(dist, start, stop, resolution, width):
    offset = jnp.linspace(start, stop, resolution, dtype=jnp.float32)
    coeff = -0.5 / ((stop - start) * width) ** 2
    d = dist[:, None] - offset[None, :]
    return jnp.exp(coeff * d * d)


if __name__ == "__main__":
    # Module __init__ defaults.
    start, stop, resolution, width = 0.0, 5.0, 50, 0.05

    key = jax.random.PRNGKey(0)

    # Case 1: default (large-block) path; block clamps to the input size.
    N1 = 200
    dist1 = jax.random.uniform(key, (N1,), dtype=jnp.float32,
                               minval=0.0, maxval=stop)
    out1 = gaussian_smearing(dist1, start=start, stop=stop,
                             resolution=resolution, width=width)
    out1 = jax.block_until_ready(out1)
    ref1 = gaussian_smearing_ref(dist1, start, stop, resolution, width)
    assert out1.shape == (N1, resolution)
    assert out1.dtype == jnp.float32
    assert jnp.allclose(out1, ref1, atol=1e-5, rtol=1e-5)

    # Case 2: ragged N with an explicit small block -> multi-step grid plus
    # tail padding/slicing path.
    N2 = 130
    dist2 = jax.random.uniform(jax.random.PRNGKey(1), (N2,), dtype=jnp.float32,
                               minval=0.0, maxval=stop)
    out2 = gaussian_smearing(dist2, start=start, stop=stop,
                             resolution=resolution, width=width, block_n=64)
    out2 = jax.block_until_ready(out2)
    ref2 = gaussian_smearing_ref(dist2, start, stop, resolution, width)
    assert out2.shape == (N2, resolution)
    assert jnp.allclose(out2, ref2, atol=1e-5, rtol=1e-5)

    print("KERNEL_OK")
</pallas_src>

<mosaic_0001>
module attributes {stable_mosaic.version = 11 : i64} {
  func.func @_gaussian_smearing_kernel(%arg0: i32, %arg1: memref<200x1xf32, #tpu.memory_space<vmem>>, %arg2: memref<200x50xf32, #tpu.memory_space<vmem>>) attributes {dimension_semantics = [#tpu.dimension_semantics<parallel>], iteration_bounds = array<i64: 1>, scalar_prefetch = 0 : i64, scratch_operands = 0 : i64, tpu.core_type = #tpu.core_type<tc>, window_params = [{transform_indices = @transform_0, window_bounds = array<i64: 200, 1>}, {transform_indices = @transform_1, window_bounds = array<i64: 200, 50>}]} {
    %0 = tpu.iota {dimensions = array<i32: 1>} : vector<1x50xi32>
    %1 = arith.sitofp %0 : vector<1x50xi32> to vector<1x50xf32>
    %cst = arith.constant 0.10204082 : f32
    %2 = vector.broadcast %cst : f32 to vector<1x50xf32>
    %3 = arith.mulf %2, %1 : vector<1x50xf32>
    %cst_0 = arith.constant 0.000000e+00 : f32
    %4 = vector.broadcast %cst_0 : f32 to vector<1x50xf32>
    %5 = arith.addf %4, %3 : vector<1x50xf32>
    %c0 = arith.constant 0 : index
    %c0_1 = arith.constant 0 : index
    %6 = vector.load %arg1[%c0, %c0_1] : memref<200x1xf32, #tpu.memory_space<vmem>>, vector<200x1xf32>
    %7 = vector.broadcast %6 : vector<200x1xf32> to vector<200x50xf32>
    %8 = vector.broadcast %5 : vector<1x50xf32> to vector<200x50xf32>
    %9 = arith.subf %7, %8 : vector<200x50xf32>
    %cst_2 = arith.constant -8.000000e+00 : f32
    %10 = vector.broadcast %cst_2 : f32 to vector<200x50xf32>
    %11 = arith.mulf %10, %9 : vector<200x50xf32>
    %12 = arith.mulf %11, %9 : vector<200x50xf32>
    %13 = math.exp %12 : vector<200x50xf32>
    %c0_3 = arith.constant 0 : index
    %c0_4 = arith.constant 0 : index
    %14 = vector.load %arg2[%c0_3, %c0_4] : memref<200x50xf32, #tpu.memory_space<vmem>>, vector<200x50xf32>
    tpu.vector_store %arg2[%c0_3, %c0_4], %13 {strides = array<i32>} : memref<200x50xf32, #tpu.memory_space<vmem>>, vector<200x50xf32>,
    return
  }
  func.func @transform_0(%arg0: i32) -> (i32, i32) {
    %c0_i32 = arith.constant 0 : i32
    %c0_i32_0 = arith.constant 0 : i32
    return %arg0, %c0_i32 : i32, i32
  }
  func.func @transform_1(%arg0: i32) -> (i32, i32) {
    %c0_i32 = arith.constant 0 : i32
    %c0_i32_0 = arith.constant 0 : i32
    return %arg0, %c0_i32 : i32, i32
  }
}

</mosaic_0001>

<bundles_post_ra>
// kernel: tpu_custom_call.1
= control target key start
LH: loop header
LB: loop body
LE: loop exit
PB: predicated region body
PF: predicated region fallthrough
CT: control target
= control target key end

     0   :  { %v372_v0 = vmov 0   ;;  %v8_v26 = vlaneseq  ;;  %vm288_vm0 = vcmask 408576   ;;  %s585_s0 = inlined_call_operand.vmem [shape: f32[200,1], index: 0, kind: input, shape index: {}]   ;;  %s586_s1 = inlined_call_operand.vmem [shape: f32[200,50], index: 1, kind: output, shape index: {}]  }
   0x1   :  { %321 = vset.pattern.permute.xlu2 %v372_v0  ;;  %320 = vset.pattern.permute.xlu1 %v372_v0  ;;  %v17_v1 = vld [vmem:[%s585_s0 + $0x20] sm:$0xff]  ;;  %v15_v2 = vld [vmem:[%s585_s0 + $0x10] sm:$0xff]  ;;  %v18_v4 = vld [vmem:[%s585_s0 + $0x28] sm:$0xff] }
   0x2   :  { %v13_v3 = vld [vmem:[%s585_s0] sm:$0xff]  ;;  %319 = vset.pattern.permute.xlu0 %v372_v0  ;;  %60 = vperm.xlu2 %321, %v17_v1   ;;  %v16_v5 = vld [vmem:[%s585_s0 + $0x18] sm:$0xff]  ;;  %v14_v6 = vld [vmem:[%s585_s0 + $0x8] sm:$0xff]  ;;  %v9_v27 = vand.u32 127, %v8_v26 }
   0x3   :  { %50 = vperm.xlu1 %320, %v15_v2   ;;  %40 = vperm.xlu0 %319, %v13_v3   ;;  %v21_v7 = vld [vmem:[%s585_s0 + $0x40] sm:$0xff]  ;;  %v20_v8 = vld [vmem:[%s585_s0 + $0x38] sm:$0xff]  ;;  %v19_v9 = vld [vmem:[%s585_s0 + $0x30] sm:$0xff] }
   0x4   :  { %v24_v10 = vld [vmem:[%s585_s0 + $0x58] sm:$0xff]  ;;  %v23_v11 = vld [vmem:[%s585_s0 + $0x50] sm:$0xff]  ;;  %v22_v12 = vld [vmem:[%s585_s0 + $0x48] sm:$0xff]  ;;  %v10_v28 = vcvt.s32.f32 %v9_v27 }
   0x5   :  { %v27_v13 = vld [vmem:[%s585_s0 + $0x70] sm:$0xff]  ;;  %v26_v14 = vld [vmem:[%s585_s0 + $0x68] sm:$0xff]  ;;  %v25_v15 = vld [vmem:[%s585_s0 + $0x60] sm:$0xff] }
   0x6   :  { %v30_v16 = vld [vmem:[%s585_s0 + $0x88] sm:$0xff]  ;;  %v29_v17 = vld [vmem:[%s585_s0 + $0x80] sm:$0xff]  ;;  %v28_v18 = vld [vmem:[%s585_s0 + $0x78] sm:$0xff]  ;;  %v458_v29 = vmul.f32 0.10204082, %v10_v28 }
   0x7   :  { %v33_v19 = vld [vmem:[%s585_s0 + $0xa0] sm:$0xff]  ;;  %v32_v20 = vld [vmem:[%s585_s0 + $0x98] sm:$0xff]  ;;  %v31_v21 = vld [vmem:[%s585_s0 + $0x90] sm:$0xff] }
   0x8   :  { %v36_v22 = vld [vmem:[%s585_s0 + $0xb8] sm:$0xff]  ;;  %v35_v23 = vld [vmem:[%s585_s0 + $0xb0] sm:$0xff]  ;;  %v34_v24 = vld [vmem:[%s585_s0 + $0xa8] sm:$0xff] }
   0x9   :  { %v37_v25 = vld [vmem:[%s585_s0 + $0xc0] sm:$0xff] }
   0xa   :  { %65 = vperm.xlu2 %321, %v18_v4  }
   0xb   :  { %55 = vperm.xlu1 %320, %v16_v5   ;;  %45 = vperm.xlu0 %319, %v14_v6  }
  0x12   :  { %80 = vperm.xlu2 %321, %v21_v7  }
  0x13   :  { %75 = vperm.xlu1 %320, %v20_v8   ;;  %70 = vperm.xlu0 %319, %v19_v9  }
  0x1a   :  { %95 = vperm.xlu2 %321, %v24_v10  }
  0x1b   :  { %90 = vperm.xlu1 %320, %v23_v11   ;;  %85 = vperm.xlu0 %319, %v22_v12  }
  0x22   :  { %110 = vperm.xlu2 %321, %v27_v13  }
  0x23   :  { %105 = vperm.xlu1 %320, %v26_v14   ;;  %100 = vperm.xlu0 %319, %v25_v15  }
  0x2a   :  { %125 = vperm.xlu2 %321, %v30_v16  }
  0x2b   :  { %120 = vperm.xlu1 %320, %v29_v17   ;;  %115 = vperm.xlu0 %319, %v28_v18  }
  0x32   :  { %140 = vperm.xlu2 %321, %v33_v19  }
  0x33   :  { %135 = vperm.xlu1 %320, %v32_v20   ;;  %130 = vperm.xlu0 %319, %v31_v21  }
  0x3a   :  { %155 = vperm.xlu2 %321, %v36_v22  }
  0x3b   :  { %150 = vperm.xlu1 %320, %v35_v23   ;;  %145 = vperm.xlu0 %319, %v34_v24  }
  0x43   :  { %160 = vperm.xlu0 %319, %v37_v25  }
  0x5c   :  { %v61_v30 = vpop.permute.xlu2 %60 }
  0x5d   :  { %v167_v31 = vsub.f32 %v61_v30, %v458_v29 }
  0x5f   :  { %v192_v32 = vmul.f32 -8.0, %v167_v31 }
  0x61   :  { %v217_v33 = vmul.f32 %v192_v32, %v167_v31 }
  0x63   :  { %v246_v34 = vmul.f32 1.442695, %v217_v33 }
  0x64   :  { %v66_v35 = vpop.permute.xlu2 %65 }
  0x65   :  { %322 = vpow2.f32 %v246_v34  ;;  %v168_v36 = vsub.f32 %v66_v35, %v458_v29 }
  0x67   :  { %v193_v37 = vmul.f32 -8.0, %v168_v36 }
  0x69   :  { %v218_v38 = vmul.f32 %v193_v37, %v168_v36 }
  0x6b   :  { %v323_v39 = vpop.eup %322  ;;  %v248_v40 = vmul.f32 1.442695, %v218_v38 }
  0x6c   :  { %293 = vst.msk [vmem:[%s586_s1 + $0x20] sm:$0xff] %vm288_vm0, %v323_v39  ;;  %v81_v41 = vpop.permute.xlu2 %80 }
  0x6d   :  { %324 = vpow2.f32 %v248_v40  ;;  %v171_v42 = vsub.f32 %v81_v41, %v458_v29 }
  0x6f   :  { %v196_v43 = vmul.f32 -8.0, %v171_v42 }
  0x71   :  { %v221_v44 = vmul.f32 %v196_v43, %v171_v42 }
  0x73   :  { %v325_v45 = vpop.eup %324  ;;  %v254_v46 = vmul.f32 1.442695, %v221_v44 }
  0x74   :  { %294 = vst.msk [vmem:[%s586_s1 + $0x28] sm:$0xff] %vm288_vm0, %v325_v45  ;;  %v96_v47 = vpop.permute.xlu2 %95 }
  0x75   :  { %326 = vpow2.f32 %v254_v46  ;;  %v174_v48 = vsub.f32 %v96_v47, %v458_v29  ;;  %v51_v49 = vpop.permute.xlu1 %50  ;;  %v41_v50 = vpop.permute.xlu0 %40 }
  0x76   :  { %v165_v51 = vsub.f32 %v51_v49, %v458_v29  ;;  %v163_v52 = vsub.f32 %v41_v50, %v458_v29 }
  0x77   :  { %v199_v53 = vmul.f32 -8.0, %v174_v48 }
  0x78   :  { %v190_v54 = vmul.f32 -8.0, %v165_v51  ;;  %v188_v55 = vmul.f32 -8.0, %v163_v52 }
  0x79   :  { %v224_v56 = vmul.f32 %v199_v53, %v174_v48 }
  0x7a   :  { %v215_v57 = vmul.f32 %v190_v54, %v165_v51  ;;  %v213_v58 = vmul.f32 %v188_v55, %v163_v52 }
  0x7b   :  { %v327_v59 = vpop.eup %326  ;;  %v260_v60 = vmul.f32 1.442695, %v224_v56 }
  0x7c   :  { %297 = vst.msk [vmem:[%s586_s1 + $0x40] sm:$0xff] %vm288_vm0, %v327_v59  ;;  %v242_v61 = vmul.f32 1.442695, %v215_v57  ;;  %v238_v62 = vmul.f32 1.442695, %v213_v58  ;;  %v111_v63 = vpop.permute.xlu2 %110 }
  0x7d   :  { %328 = vpow2.f32 %v260_v60  ;;  %v177_v0 = vsub.f32 %v111_v63, %v458_v29  ;;  %v56_v1 = vpop.permute.xlu1 %55  ;;  %v46_v2 = vpop.permute.xlu0 %45 }
  0x7e   :  { %330 = vpow2.f32 %v242_v61  ;;  %v166_v3 = vsub.f32 %v56_v1, %v458_v29  ;;  %v164_v4 = vsub.f32 %v46_v2, %v458_v29 }
  0x7f   :  { %332 = vpow2.f32 %v238_v62  ;;  %v202_v5 = vmul.f32 -8.0, %v177_v0 }
  0x80   :  { %v191_v6 = vmul.f32 -8.0, %v166_v3  ;;  %v189_v7 = vmul.f32 -8.0, %v164_v4 }
  0x81   :  { %v227_v8 = vmul.f32 %v202_v5, %v177_v0 }
  0x82   :  { %v216_v9 = vmul.f32 %v191_v6, %v166_v3  ;;  %v214_v10 = vmul.f32 %v189_v7, %v164_v4 }
  0x83   :  { %v329_v11 = vpop.eup %328  ;;  %v266_v12 = vmul.f32 1.442695, %v227_v8 }
  0x84   :  { %v331_v13 = vpop.eup %330  ;;  %300 = vst.msk [vmem:[%s586_s1 + $0x58] sm:$0xff] %vm288_vm0, %v329_v11  ;;  %v244_v14 = vmul.f32 1.442695, %v216_v9  ;;  %v240_v15 = vmul.f32 1.442695, %v214_v10  ;;  %v126_v16 = vpop.permute.xlu2 %125 }
  0x85   :  { %v333_v17 = vpop.eup %332  ;;  %291 = vst.msk [vmem:[%s586_s1 + $0x10] sm:$0xff] %vm288_vm0, %v331_v13  ;;  %334 = vpow2.f32 %v266_v12  ;;  %v180_v18 = vsub.f32 %v126_v16, %v458_v29  ;;  %v76_v19 = vpop.permute.xlu1 %75 }
  0x86   :  { %v71_v20 = vpop.permute.xlu0 %70  ;;  %289 = vst.msk [vmem:[%s586_s1] sm:$0xff] %vm288_vm0, %v333_v17  ;;  %336 = vpow2.f32 %v244_v14  ;;  %v170_v21 = vsub.f32 %v76_v19, %v458_v29 }
  0x87   :  { %v169_v22 = vsub.f32 %v71_v20, %v458_v29  ;;  %338 = vpow2.f32 %v240_v15  ;;  %v205_v23 = vmul.f32 -8.0, %v180_v18 }
  0x88   :  { %v195_v24 = vmul.f32 -8.0, %v170_v21 }
  0x89   :  { %v194_v25 = vmul.f32 -8.0, %v169_v22  ;;  %v230_v26 = vmul.f32 %v205_v23, %v180_v18 }
  0x8a   :  { %v220_v27 = vmul.f32 %v195_v24, %v170_v21 }
  0x8b   :  { %v219_v28 = vmul.f32 %v194_v25, %v169_v22  ;;  %v335_v30 = vpop.eup %334  ;;  %v272_v31 = vmul.f32 1.442695, %v230_v26 }
  0x8c   :  { %v337_v32 = vpop.eup %336  ;;  %303 = vst.msk [vmem:[%s586_s1 + $0x70] sm:$0xff] %vm288_vm0, %v335_v30  ;;  %v252_v33 = vmul.f32 1.442695, %v220_v27  ;;  %v141_v35 = vpop.permute.xlu2 %140 }
  0x8d   :  { %v250_v34 = vmul.f32 1.442695, %v219_v28  ;;  %v339_v36 = vpop.eup %338  ;;  %292 = vst.msk [vmem:[%s586_s1 + $0x18] sm:$0xff] %vm288_vm0, %v337_v32  ;;  %340 = vpow2.f32 %v272_v31  ;;  %v183_v37 = vsub.f32 %v141_v35, %v458_v29  ;;  %v91_v38 = vpop.permute.xlu1 %90 }
  0x8e   :  { %v86_v39 = vpop.permute.xlu0 %85  ;;  %290 = vst.msk [vmem:[%s586_s1 + $0x8] sm:$0xff] %vm288_vm0, %v339_v36  ;;  %342 = vpow2.f32 %v252_v33  ;;  %v173_v40 = vsub.f32 %v91_v38, %v458_v29 }
  0x8f   :  { %v172_v41 = vsub.f32 %v86_v39, %v458_v29  ;;  %344 = vpow2.f32 %v250_v34  ;;  %v208_v42 = vmul.f32 -8.0, %v183_v37 }
  0x90   :  { %v198_v43 = vmul.f32 -8.0, %v173_v40 }
  0x91   :  { %v197_v44 = vmul.f32 -8.0, %v172_v41  ;;  %v233_v45 = vmul.f32 %v208_v42, %v183_v37 }
  0x92   :  { %v223_v46 = vmul.f32 %v198_v43, %v173_v40 }
  0x93   :  { %v222_v47 = vmul.f32 %v197_v44, %v172_v41  ;;  %v341_v48 = vpop.eup %340  ;;  %v278_v49 = vmul.f32 1.442695, %v233_v45 }
  0x94   :  { %v343_v50 = vpop.eup %342  ;;  %306 = vst.msk [vmem:[%s586_s1 + $0x88] sm:$0xff] %vm288_vm0, %v341_v48  ;;  %v258_v51 = vmul.f32 1.442695, %v223_v46  ;;  %v156_v53 = vpop.permute.xlu2 %155 }
  0x95   :  { %v256_v52 = vmul.f32 1.442695, %v222_v47  ;;  %v345_v54 = vpop.eup %344  ;;  %296 = vst.msk [vmem:[%s586_s1 + $0x38] sm:$0xff] %vm288_vm0, %v343_v50  ;;  %346 = vpow2.f32 %v278_v49  ;;  %v186_v55 = vsub.f32 %v156_v53, %v458_v29  ;;  %v106_v56 = vpop.permute.xlu1 %105 }
  0x96   :  { %v101_v57 = vpop.permute.xlu0 %100  ;;  %295 = vst.msk [vmem:[%s586_s1 + $0x30] sm:$0xff] %vm288_vm0, %v345_v54  ;;  %348 = vpow2.f32 %v258_v51  ;;  %v176_v58 = vsub.f32 %v106_v56, %v458_v29 }
  0x97   :  { %v175_v59 = vsub.f32 %v101_v57, %v458_v29  ;;  %350 = vpow2.f32 %v256_v52  ;;  %v211_v60 = vmul.f32 -8.0, %v186_v55 }
  0x98   :  { %v201_v61 = vmul.f32 -8.0, %v176_v58 }
  0x99   :  { %v200_v62 = vmul.f32 -8.0, %v175_v59  ;;  %v236_v63 = vmul.f32 %v211_v60, %v186_v55 }
  0x9a   :  { %v226_v0 = vmul.f32 %v201_v61, %v176_v58 }
  0x9b   :  { %v225_v1 = vmul.f32 %v200_v62, %v175_v59  ;;  %v347_v2 = vpop.eup %346  ;;  %v284_v3 = vmul.f32 1.442695, %v236_v63 }
  0x9c   :  { %v349_v4 = vpop.eup %348  ;;  %309 = vst.msk [vmem:[%s586_s1 + $0xa0] sm:$0xff] %vm288_vm0, %v347_v2  ;;  %v264_v5 = vmul.f32 1.442695, %v226_v0 }
  0x9d   :  { %v262_v6 = vmul.f32 1.442695, %v225_v1  ;;  %v351_v7 = vpop.eup %350  ;;  %299 = vst.msk [vmem:[%s586_s1 + $0x50] sm:$0xff] %vm288_vm0, %v349_v4  ;;  %352 = vpow2.f32 %v284_v3  ;;  %v121_v8 = vpop.permute.xlu1 %120 }
  0x9e   :  { %v116_v9 = vpop.permute.xlu0 %115  ;;  %298 = vst.msk [vmem:[%s586_s1 + $0x48] sm:$0xff] %vm288_vm0, %v351_v7  ;;  %354 = vpow2.f32 %v264_v5  ;;  %v179_v10 = vsub.f32 %v121_v8, %v458_v29 }
  0x9f   :  { %v178_v11 = vsub.f32 %v116_v9, %v458_v29  ;;  %356 = vpow2.f32 %v262_v6 }
  0xa0   :  { %v204_v12 = vmul.f32 -8.0, %v179_v10 }
  0xa1   :  { %v203_v13 = vmul.f32 -8.0, %v178_v11 }
  0xa2   :  { %v229_v14 = vmul.f32 %v204_v12, %v179_v10 }
  0xa3   :  { %v228_v15 = vmul.f32 %v203_v13, %v178_v11  ;;  %v353_v16 = vpop.eup %352 }
  0xa4   :  { %v355_v17 = vpop.eup %354  ;;  %312 = vst.msk [vmem:[%s586_s1 + $0xb8] sm:$0xff] %vm288_vm0, %v353_v16  ;;  %v270_v18 = vmul.f32 1.442695, %v229_v14 }
  0xa5   :  { %v268_v19 = vmul.f32 1.442695, %v228_v15  ;;  %v357_v20 = vpop.eup %356  ;;  %302 = vst.msk [vmem:[%s586_s1 + $0x68] sm:$0xff] %vm288_vm0, %v355_v17  ;;  %v136_v21 = vpop.permute.xlu1 %135 }
  0xa6   :  { %v131_v22 = vpop.permute.xlu0 %130  ;;  %301 = vst.msk [vmem:[%s586_s1 + $0x60] sm:$0xff] %vm288_vm0, %v357_v20  ;;  %358 = vpow2.f32 %v270_v18  ;;  %v182_v23 = vsub.f32 %v136_v21, %v458_v29 }
  0xa7   :  { %v181_v24 = vsub.f32 %v131_v22, %v458_v29  ;;  %360 = vpow2.f32 %v268_v19 }
  0xa8   :  { %v207_v25 = vmul.f32 -8.0, %v182_v23 }
  0xa9   :  { %v206_v26 = vmul.f32 -8.0, %v181_v24 }
  0xaa   :  { %v232_v27 = vmul.f32 %v207_v25, %v182_v23 }
  0xab   :  { %v231_v28 = vmul.f32 %v206_v26, %v181_v24 }
  0xac   :  { %v359_v30 = vpop.eup %358  ;;  %v276_v31 = vmul.f32 1.442695, %v232_v27 }
  0xad   :  { %v274_v32 = vmul.f32 1.442695, %v231_v28  ;;  %v361_v33 = vpop.eup %360  ;;  %305 = vst.msk [vmem:[%s586_s1 + $0x80] sm:$0xff] %vm288_vm0, %v359_v30  ;;  %v151_v34 = vpop.permute.xlu1 %150 }
  0xae   :  { %v146_v35 = vpop.permute.xlu0 %145  ;;  %304 = vst.msk [vmem:[%s586_s1 + $0x78] sm:$0xff] %vm288_vm0, %v361_v33  ;;  %362 = vpow2.f32 %v276_v31  ;;  %v185_v36 = vsub.f32 %v151_v34, %v458_v29 }
  0xaf   :  { %v184_v37 = vsub.f32 %v146_v35, %v458_v29  ;;  %364 = vpow2.f32 %v274_v32 }
  0xb0   :  { %v210_v38 = vmul.f32 -8.0, %v185_v36 }
  0xb1   :  { %v209_v39 = vmul.f32 -8.0, %v184_v37 }
  0xb2   :  { %v235_v40 = vmul.f32 %v210_v38, %v185_v36 }
  0xb3   :  { %v234_v41 = vmul.f32 %v209_v39, %v184_v37 }
  0xb4   :  { %v363_v42 = vpop.eup %362  ;;  %v282_v43 = vmul.f32 1.442695, %v235_v40 }
  0xb5   :  { %v280_v44 = vmul.f32 1.442695, %v234_v41  ;;  %v365_v45 = vpop.eup %364  ;;  %308 = vst.msk [vmem:[%s586_s1 + $0x98] sm:$0xff] %vm288_vm0, %v363_v42 }
  0xb6   :  { %v161_v46 = vpop.permute.xlu0 %160  ;;  %307 = vst.msk [vmem:[%s586_s1 + $0x90] sm:$0xff] %vm288_vm0, %v365_v45  ;;  %366 = vpow2.f32 %v282_v43 }
  0xb7   :  { %v187_v47 = vsub.f32 %v161_v46, %v458_v29  ;;  %368 = vpow2.f32 %v280_v44 }
  0xb9   :  { %v212_v48 = vmul.f32 -8.0, %v187_v47 }
  0xbb   :  { %v237_v49 = vmul.f32 %v212_v48, %v187_v47 }
  0xbc   :  { %v367_v50 = vpop.eup %366 }
  0xbd   :  { %v286_v51 = vmul.f32 1.442695, %v237_v49  ;;  %v369_v52 = vpop.eup %368  ;;  %311 = vst.msk [vmem:[%s586_s1 + $0xb0] sm:$0xff] %vm288_vm0, %v367_v50 }
  0xbe   :  { %310 = vst.msk [vmem:[%s586_s1 + $0xa8] sm:$0xff] %vm288_vm0, %v369_v52 }
  0xbf   :  { %370 = vpow2.f32 %v286_v51 }
  0xc5   :  { %v371_v53 = vpop.eup %370 }
  0xc6   :  { %313 = vst.msk [vmem:[%s586_s1 + $0xc0] sm:$0xff] %vm288_vm0, %v371_v53 }

</bundles_post_ra>
